<compile_context>
chip_gen: v7x
topology: tpu7x:2x2x1
jax: 0.10.0
libtpu: 0.0.40
codegen_flags: <defaults>
</compile_context>

<pallas_src>
import math
import jax
import jax.numpy as jnp
from jax.experimental import pallas as pl
from jax.experimental.pallas import tpu as pltpu

D_PAD = 128  # lane-dense padded feature width (all feature dims padded to 128)


# ----------------------------- Pallas kernel ------------------------------ #

def _make_fused_kernel(num_hidden, out_feats):
    """Builds a fused GraphSAGE forward kernel (unrolled over layers)."""

    def kernel(*refs):
        a_ref, x_ref = refs[0], refs[1]
        o_ref = refs[-1]

        a = a_ref[...]                        # (N, N)     bf16 row-normalized adjacency
        x = x_ref[...]                        # (N, D_PAD) bf16 node features (zero padded)

        idx = 2
        # Hidden layers: relu(BN(X @ Ws + A @ (X @ Wn)))  — BN scale folded into W.
        for _ in range(num_hidden):
            w = refs[idx][...]                # (D_PAD, 2*D_PAD) bf16  [Ws*s | Wn*s]
            b = refs[idx + 1][...]            # (1, D_PAD)       f32   BN shift
            idx += 2
            d = w.shape[1] // 2
            p = jnp.dot(x, w, preferred_element_type=jnp.float32)        # (N, 2*D_PAD)
            h = p[:, :d] + jnp.dot(a, p[:, d:].astype(jnp.bfloat16),
                                   preferred_element_type=jnp.float32)   # self + neigh
            h = jnp.maximum(h + b, 0.0)       # BN shift + ReLU (f32 epilogue)
            x = h.astype(jnp.bfloat16)
            # dropout: identity in eval mode

        # Final SAGEConv + log_softmax along the feature axis.
        wf = refs[idx][...]                   # (D_PAD, 2*D_PAD) bf16
        d = wf.shape[1] // 2
        p = jnp.dot(x, wf, preferred_element_type=jnp.float32)
        h = p[:, :d] + jnp.dot(a, p[:, d:].astype(jnp.bfloat16),
                               preferred_element_type=jnp.float32)

        # Padded lanes must not contribute to the logsumexp -> mask to -inf.
        col = jax.lax.broadcasted_iota(jnp.int32, h.shape, 1)
        h = jnp.where(col < out_feats, h, -jnp.inf)

        m = jnp.max(h, axis=-1, keepdims=True)
        z = h - m
        lse = jnp.log(jnp.sum(jnp.exp(z), axis=-1, keepdims=True))
        o_ref[...] = (z - lse).astype(o_ref.dtype)

    return kernel


# ------------------------------ Wrapper ------------------------------------ #

def _full_spec(shape):
    # Whole-array block (block_shape == array dims satisfies the (8,128) rule).
    return pl.BlockSpec(shape, lambda i: tuple(0 for _ in shape))


def graphsage_forward(x, a, hidden_params, w_final, out_feats):
    """Fused forward: x (N, D_in) f32, a (N, N) f32 -> (N, out_feats) f32 log-probs."""
    n, d_in = x.shape
    # Pad features to 128 lanes and cast MXU inputs to bf16 once, host-side.
    x_pad = jnp.zeros((n, D_PAD), jnp.float32).at[:, :d_in].set(x).astype(jnp.bfloat16)
    a_bf = a.astype(jnp.bfloat16)

    kernel = _make_fused_kernel(len(hidden_params), out_feats)

    inputs = [a_bf, x_pad]
    in_specs = [_full_spec(a_bf.shape), _full_spec(x_pad.shape)]
    for w, b in hidden_params:
        inputs += [w, b]
        in_specs += [_full_spec(w.shape), _full_spec(b.shape)]
    inputs.append(w_final)
    in_specs.append(_full_spec(w_final.shape))

    out = pl.pallas_call(
        kernel,
        out_shape=jax.ShapeDtypeStruct((n, D_PAD), jnp.float32),
        grid=(1,),
        in_specs=in_specs,
        out_specs=_full_spec((n, D_PAD)),
        compiler_params=pltpu.CompilerParams(
            dimension_semantics=("arbitrary",),
            vmem_limit_bytes=32 * 1024 * 1024,
        ),
    )(*inputs)
    # Slice the lane-padded output back to the real class count.
    return out[:, :out_feats]


# --------------------------- Parameter helpers ----------------------------- #

def xavier_uniform_t(key, in_feats, out_feats, gain):
    """PyTorch xavier_uniform_ on a (out, in) Linear weight, returned transposed (in, out)."""
    bound = gain * math.sqrt(6.0 / (in_feats + out_feats))
    w = jax.random.uniform(key, (out_feats, in_feats), jnp.float32, -bound, bound)
    return w.T  # (in, out) for row-major matmul in the kernel


def _pad_concat(ws, wn):
    """Pad (d_in, d_out) weights to (D_PAD, D_PAD), concat [Ws | Wn], cast to bf16."""
    d_in, d_out = ws.shape
    w = jnp.zeros((D_PAD, 2 * D_PAD), jnp.float32)
    w = w.at[:d_in, :d_out].set(ws)
    w = w.at[:d_in, D_PAD:D_PAD + d_out].set(wn)
    return w.astype(jnp.bfloat16)


def init_graphsage_params(key, in_feats, hidden_feats, out_feats, num_layers):
    gain = math.sqrt(2.0)  # nn.init.calculate_gain('relu')
    eps = 1e-5
    bn_scale = 1.0 / math.sqrt(1.0 + eps)  # BN eval with reset stats (mean=0, var=1, gamma=1)
    dims = [in_feats] + [hidden_feats] * (num_layers - 1) + [out_feats]
    keys = jax.random.split(key, 2 * num_layers)

    hidden = []
    for i in range(num_layers - 1):
        d_in, d_out = dims[i], dims[i + 1]
        # BN scale folded into the weights; shift (beta=0) kept as a bias row.
        ws = xavier_uniform_t(keys[2 * i], d_in, d_out, gain) * bn_scale
        wn = xavier_uniform_t(keys[2 * i + 1], d_in, d_out, gain) * bn_scale
        shift = jnp.zeros((1, D_PAD), jnp.float32)
        hidden.append((_pad_concat(ws, wn), shift))

    d_in, d_out = dims[-2], dims[-1]
    ws_f = xavier_uniform_t(keys[-2], d_in, d_out, gain)
    wn_f = xavier_uniform_t(keys[-1], d_in, d_out, gain)
    return hidden, _pad_concat(ws_f, wn_f)


def make_adjacency(key, n):
    """Deterministic synthetic graph, row-normalized (mean aggregation)."""
    mask = (jax.random.uniform(key, (n, n)) < 0.2).astype(jnp.float32)
    mask = mask + jnp.eye(n, dtype=jnp.float32)            # ensure non-empty rows
    deg = jnp.sum(mask, axis=1, keepdims=True)
    return mask / deg


# ------------------------------- Main -------------------------------------- #

if __name__ == "__main__":
    N = 64            # number of nodes
    IN_FEATS = 32
    HIDDEN_FEATS = 32
    OUT_FEATS = 16
    NUM_LAYERS = 3    # 2 hidden SAGEConv+BN+ReLU layers + final SAGEConv

    root = jax.random.PRNGKey(0)
    k_feat, k_graph, k_params = jax.random.split(root, 3)

    x = jax.random.normal(k_feat, (N, IN_FEATS), jnp.float32)
    a = make_adjacency(k_graph, N)
    hidden_params, w_final = init_graphsage_params(
        k_params, IN_FEATS, HIDDEN_FEATS, OUT_FEATS, NUM_LAYERS)

    out = graphsage_forward(x, a, hidden_params, w_final, OUT_FEATS)
    out = jax.block_until_ready(out)

    # sanity: log_softmax rows should (log-)sum to ~0
    row_logsumexp = jax.scipy.special.logsumexp(out, axis=-1)
    assert out.shape == (N, OUT_FEATS)
    assert bool(jnp.all(jnp.abs(row_logsumexp) < 1e-4))
    assert bool(jnp.all(jnp.isfinite(out)))

    print("KERNEL_OK")
</pallas_src>

<mosaic_0001>
module attributes {stable_mosaic.version = 11 : i64} {
  func.func @kernel(%arg0: i32, %arg1: memref<64x64xbf16, #tpu.memory_space<vmem>>, %arg2: memref<64x128xbf16, #tpu.memory_space<vmem>>, %arg3: memref<128x256xbf16, #tpu.memory_space<vmem>>, %arg4: memref<1x128xf32, #tpu.memory_space<vmem>>, %arg5: memref<128x256xbf16, #tpu.memory_space<vmem>>, %arg6: memref<1x128xf32, #tpu.memory_space<vmem>>, %arg7: memref<128x256xbf16, #tpu.memory_space<vmem>>, %arg8: memref<64x128xf32, #tpu.memory_space<vmem>>) attributes {dimension_semantics = [#tpu.dimension_semantics<arbitrary>], iteration_bounds = array<i64: 1>, scalar_prefetch = 0 : i64, scratch_operands = 0 : i64, tpu.core_type = #tpu.core_type<tc>, window_params = [{pipeline_mode = #tpu.pipeline_mode<synchronous>, transform_indices = @transform_0, window_bounds = array<i64: 64, 64>}, {pipeline_mode = #tpu.pipeline_mode<synchronous>, transform_indices = @transform_1, window_bounds = array<i64: 64, 128>}, {pipeline_mode = #tpu.pipeline_mode<synchronous>, transform_indices = @transform_2, window_bounds = array<i64: 128, 256>}, {pipeline_mode = #tpu.pipeline_mode<synchronous>, transform_indices = @transform_3, window_bounds = array<i64: 1, 128>}, {pipeline_mode = #tpu.pipeline_mode<synchronous>, transform_indices = @transform_4, window_bounds = array<i64: 128, 256>}, {pipeline_mode = #tpu.pipeline_mode<synchronous>, transform_indices = @transform_5, window_bounds = array<i64: 1, 128>}, {pipeline_mode = #tpu.pipeline_mode<synchronous>, transform_indices = @transform_6, window_bounds = array<i64: 128, 256>}, {pipeline_mode = #tpu.pipeline_mode<synchronous>, transform_indices = @transform_7, window_bounds = array<i64: 64, 128>}]} {
    %c0 = arith.constant 0 : index
    %c0_0 = arith.constant 0 : index
    %0 = vector.load %arg1[%c0, %c0_0] : memref<64x64xbf16, #tpu.memory_space<vmem>>, vector<64x64xbf16>
    %c0_1 = arith.constant 0 : index
    %c0_2 = arith.constant 0 : index
    %1 = vector.load %arg2[%c0_1, %c0_2] : memref<64x128xbf16, #tpu.memory_space<vmem>>, vector<64x128xbf16>
    %c0_3 = arith.constant 0 : index
    %c0_4 = arith.constant 0 : index
    %2 = vector.load %arg3[%c0_3, %c0_4] : memref<128x256xbf16, #tpu.memory_space<vmem>>, vector<128x256xbf16>
    %c0_5 = arith.constant 0 : index
    %c0_6 = arith.constant 0 : index
    %3 = vector.load %arg4[%c0_5, %c0_6] : memref<1x128xf32, #tpu.memory_space<vmem>>, vector<1x128xf32>
    %cst = arith.constant dense<0.000000e+00> : vector<64x256xf32>
    %4 = tpu.matmul %1, %2, %cst {dimension_numbers = #tpu.dot_dimension_numbers<[1], [0], [0], [1], [0, 0, 1, 1], [], []>} : vector<64x128xbf16>, vector<128x256xbf16>, vector<64x256xf32> -> vector<64x256xf32>
    %5 = vector.extract_strided_slice %4 {offsets = [0, 0], sizes = [64, 128], strides = [1, 1]} : vector<64x256xf32> to vector<64x128xf32>
    %6 = vector.extract_strided_slice %4 {offsets = [0, 128], sizes = [64, 128], strides = [1, 1]} : vector<64x256xf32> to vector<64x128xf32>
    %7 = arith.truncf %6 : vector<64x128xf32> to vector<64x128xbf16>
    %cst_7 = arith.constant dense<0.000000e+00> : vector<64x128xf32>
    %8 = tpu.matmul %0, %7, %cst_7 {dimension_numbers = #tpu.dot_dimension_numbers<[1], [0], [0], [1], [0, 0, 1, 1], [], []>} : vector<64x64xbf16>, vector<64x128xbf16>, vector<64x128xf32> -> vector<64x128xf32>
    %9 = arith.addf %5, %8 : vector<64x128xf32>
    %10 = vector.broadcast %3 : vector<1x128xf32> to vector<64x128xf32>
    %11 = arith.addf %9, %10 : vector<64x128xf32>
    %cst_8 = arith.constant 0.000000e+00 : f32
    %12 = vector.broadcast %cst_8 : f32 to vector<64x128xf32>
    %13 = arith.maximumf %11, %12 : vector<64x128xf32>
    %14 = arith.truncf %13 : vector<64x128xf32> to vector<64x128xbf16>
    %c0_9 = arith.constant 0 : index
    %c0_10 = arith.constant 0 : index
    %15 = vector.load %arg5[%c0_9, %c0_10] : memref<128x256xbf16, #tpu.memory_space<vmem>>, vector<128x256xbf16>
    %c0_11 = arith.constant 0 : index
    %c0_12 = arith.constant 0 : index
    %16 = vector.load %arg6[%c0_11, %c0_12] : memref<1x128xf32, #tpu.memory_space<vmem>>, vector<1x128xf32>
    %cst_13 = arith.constant dense<0.000000e+00> : vector<64x256xf32>
    %17 = tpu.matmul %14, %15, %cst_13 {dimension_numbers = #tpu.dot_dimension_numbers<[1], [0], [0], [1], [0, 0, 1, 1], [], []>} : vector<64x128xbf16>, vector<128x256xbf16>, vector<64x256xf32> -> vector<64x256xf32>
    %18 = vector.extract_strided_slice %17 {offsets = [0, 0], sizes = [64, 128], strides = [1, 1]} : vector<64x256xf32> to vector<64x128xf32>
    %19 = vector.extract_strided_slice %17 {offsets = [0, 128], sizes = [64, 128], strides = [1, 1]} : vector<64x256xf32> to vector<64x128xf32>
    %20 = arith.truncf %19 : vector<64x128xf32> to vector<64x128xbf16>
    %cst_14 = arith.constant dense<0.000000e+00> : vector<64x128xf32>
    %21 = tpu.matmul %0, %20, %cst_14 {dimension_numbers = #tpu.dot_dimension_numbers<[1], [0], [0], [1], [0, 0, 1, 1], [], []>} : vector<64x64xbf16>, vector<64x128xbf16>, vector<64x128xf32> -> vector<64x128xf32>
    %22 = arith.addf %18, %21 : vector<64x128xf32>
    %23 = vector.broadcast %16 : vector<1x128xf32> to vector<64x128xf32>
    %24 = arith.addf %22, %23 : vector<64x128xf32>
    %cst_15 = arith.constant 0.000000e+00 : f32
    %25 = vector.broadcast %cst_15 : f32 to vector<64x128xf32>
    %26 = arith.maximumf %24, %25 : vector<64x128xf32>
    %27 = arith.truncf %26 : vector<64x128xf32> to vector<64x128xbf16>
    %c0_16 = arith.constant 0 : index
    %c0_17 = arith.constant 0 : index
    %28 = vector.load %arg7[%c0_16, %c0_17] : memref<128x256xbf16, #tpu.memory_space<vmem>>, vector<128x256xbf16>
    %cst_18 = arith.constant dense<0.000000e+00> : vector<64x256xf32>
    %29 = tpu.matmul %27, %28, %cst_18 {dimension_numbers = #tpu.dot_dimension_numbers<[1], [0], [0], [1], [0, 0, 1, 1], [], []>} : vector<64x128xbf16>, vector<128x256xbf16>, vector<64x256xf32> -> vector<64x256xf32>
    %30 = vector.extract_strided_slice %29 {offsets = [0, 0], sizes = [64, 128], strides = [1, 1]} : vector<64x256xf32> to vector<64x128xf32>
    %31 = vector.extract_strided_slice %29 {offsets = [0, 128], sizes = [64, 128], strides = [1, 1]} : vector<64x256xf32> to vector<64x128xf32>
    %32 = arith.truncf %31 : vector<64x128xf32> to vector<64x128xbf16>
    %cst_19 = arith.constant dense<0.000000e+00> : vector<64x128xf32>
    %33 = tpu.matmul %0, %32, %cst_19 {dimension_numbers = #tpu.dot_dimension_numbers<[1], [0], [0], [1], [0, 0, 1, 1], [], []>} : vector<64x64xbf16>, vector<64x128xbf16>, vector<64x128xf32> -> vector<64x128xf32>
    %34 = arith.addf %30, %33 : vector<64x128xf32>
    %35 = tpu.iota {dimensions = array<i32: 1>} : vector<64x128xi32>
    %c16_i32 = arith.constant 16 : i32
    %36 = vector.broadcast %c16_i32 : i32 to vector<64x128xi32>
    %37 = arith.cmpi slt, %35, %36 : vector<64x128xi32>
    %cst_20 = arith.constant 0xFF800000 : f32
    %38 = vector.broadcast %cst_20 : f32 to vector<64x128xf32>
    %39 = arith.select %37, %34, %38 : vector<64x128xi1>, vector<64x128xf32>
    %cst_21 = arith.constant dense<0xFF800000> : vector<64xf32>
    %40 = vector.multi_reduction <maximumf>, %39, %cst_21 [1] : vector<64x128xf32> to vector<64xf32>
    %41 = vector.shape_cast %40 : vector<64xf32> to vector<64x1xf32>
    %42 = vector.broadcast %41 : vector<64x1xf32> to vector<64x128xf32>
    %43 = arith.subf %39, %42 : vector<64x128xf32>
    %44 = math.exp %43 : vector<64x128xf32>
    %cst_22 = arith.constant dense<0.000000e+00> : vector<64xf32>
    %45 = vector.multi_reduction <add>, %44, %cst_22 [1] : vector<64x128xf32> to vector<64xf32>
    %46 = vector.shape_cast %45 : vector<64xf32> to vector<64x1xf32>
    %47 = math.log %46 : vector<64x1xf32>
    %48 = vector.broadcast %47 : vector<64x1xf32> to vector<64x128xf32>
    %49 = arith.subf %43, %48 : vector<64x128xf32>
    %c0_23 = arith.constant 0 : index
    %c0_24 = arith.constant 0 : index
    %50 = vector.load %arg8[%c0_23, %c0_24] : memref<64x128xf32, #tpu.memory_space<vmem>>, vector<64x128xf32>
    tpu.vector_store %arg8[%c0_23, %c0_24], %49 {strides = array<i32>} : memref<64x128xf32, #tpu.memory_space<vmem>>, vector<64x128xf32>,
    return
  }
  func.func @transform_0(%arg0: i32) -> (i32, i32) {
    %c0_i32 = arith.constant 0 : i32
    %c0_i32_0 = arith.constant 0 : i32
    %c0_i32_1 = arith.constant 0 : i32
    return %c0_i32, %c0_i32_0 : i32, i32
  }
  func.func @transform_1(%arg0: i32) -> (i32, i32) {
    %c0_i32 = arith.constant 0 : i32
    %c0_i32_0 = arith.constant 0 : i32
    %c0_i32_1 = arith.constant 0 : i32
    return %c0_i32, %c0_i32_0 : i32, i32
  }
  func.func @transform_2(%arg0: i32) -> (i32, i32) {
    %c0_i32 = arith.constant 0 : i32
    %c0_i32_0 = arith.constant 0 : i32
    %c0_i32_1 = arith.constant 0 : i32
    return %c0_i32, %c0_i32_0 : i32, i32
  }
  func.func @transform_3(%arg0: i32) -> (i32, i32) {
    %c0_i32 = arith.constant 0 : i32
    %c0_i32_0 = arith.constant 0 : i32
    %c0_i32_1 = arith.constant 0 : i32
    return %c0_i32, %c0_i32_0 : i32, i32
  }
  func.func @transform_4(%arg0: i32) -> (i32, i32) {
    %c0_i32 = arith.constant 0 : i32
    %c0_i32_0 = arith.constant 0 : i32
    %c0_i32_1 = arith.constant 0 : i32
    return %c0_i32, %c0_i32_0 : i32, i32
  }
  func.func @transform_5(%arg0: i32) -> (i32, i32) {
    %c0_i32 = arith.constant 0 : i32
    %c0_i32_0 = arith.constant 0 : i32
    %c0_i32_1 = arith.constant 0 : i32
    return %c0_i32, %c0_i32_0 : i32, i32
  }
  func.func @transform_6(%arg0: i32) -> (i32, i32) {
    %c0_i32 = arith.constant 0 : i32
    %c0_i32_0 = arith.constant 0 : i32
    %c0_i32_1 = arith.constant 0 : i32
    return %c0_i32, %c0_i32_0 : i32, i32
  }
  func.func @transform_7(%arg0: i32) -> (i32, i32) {
    %c0_i32 = arith.constant 0 : i32
    %c0_i32_0 = arith.constant 0 : i32
    %c0_i32_1 = arith.constant 0 : i32
    return %c0_i32, %c0_i32_0 : i32, i32
  }
}

</mosaic_0001>

<bundles_post_ra>
// kernel: tpu_custom_call.1
= control target key start
LH: loop header
LB: loop body
LE: loop exit
PB: predicated region body
PF: predicated region fallthrough
CT: control target
= control target key end

     0   :  { %12 = vsyncpa [#allocation3], 0  ;;  %s1736_s0 = inlined_call_operand.hbm [shape: bf16[64,64], index: 0, kind: input, shape index: {}]   ;;  %s1737_s1 = inlined_call_operand.hbm [shape: bf16[64,128], index: 1, kind: input, shape index: {}]   ;;  %s1738_s2 = inlined_call_operand.hbm [shape: bf16[128,256], index: 2, kind: input, shape index: {}]   ;;  %s1739_s3 = inlined_call_operand.vmem [shape: f32[1,128], index: 3, kind: input, shape index: {}]   ;;  %s1740_s4 = inlined_call_operand.hbm [shape: bf16[128,256], index: 4, kind: input, shape index: {}]   ;;  %s1741_s5 = inlined_call_operand.vmem [shape: f32[1,128], index: 5, kind: input, shape index: {}]   ;;  %s1742_s6 = inlined_call_operand.hbm [shape: bf16[128,256], index: 6, kind: input, shape index: {}]   ;;  %s1743_s7 = inlined_call_operand.hbm [shape: f32[64,128], index: 7, kind: output, shape index: {}]  }
   0x1   :  { %13 = vsyncpa [#allocation6], 0 }
   0x2   :  { %14 = vsyncpa [#allocation9], 0 }
   0x3   :  { %15 = vsyncpa [#allocation4], 0  ;;  %s1484_s24 = smov [#allocation5]   ;;  %s1344_s28 = scalar_lea.hbm %s1737_s1, 512 }
   0x4   :  { %s33_s25 = sshll.u32 %s1484_s24, 4  ;;  %p1345_p0 = scmp.ne.s32.totalorder %s1737_s1, %s1344_s28  ;;  %s34_s25 = int_to_ptr.vmem [resolvable:$true] %s33_s25 }
   0x5   :  { %p1348_p1 = scmp.lt.u32.totalorder %s1344_s28, %s1737_s1 }
   0x7   :  { %p1350_p2 = pnand %p1348_p1, %p1345_p0 }
   0x9   :  { %1353 = shalt.err (!%p1350_p2)
}
   0xa   :  { %s1354_s10 = scalar_lea.vmem %s34_s25, 512  ;;  %p1359_p4 = scmp.lt.s32.totalorder %s34_s25, %s34_s25 }
   0xb   :  { %p1355_p3 = scmp.ne.s32.totalorder %s34_s25, %s1354_s10  ;;  %p1360_p5 = scmp.lt.s32.totalorder %s1354_s10, %s1354_s10 }
   0xd   :  { %p1361_p6 = por %p1360_p5, %p1359_p4 }
   0xf   :  { %p1362_p7 = pnand %p1361_p6, %p1355_p3 }
  0x11   :  { %1365 = shalt.err (!%p1362_p7)
}
  0x12   :  { %s1485_s11 = smov 64   ;;  %s1486_s12 = smov 4  }
  0x13   :  { %39 = dma.hbm_to_vmem [thread:$0]  %s1737_s1, 512, %s34_s25, [#allocation6], %s1485_s11, %s1485_s11, %s1486_s12  }
  0x14   :  { %s1487_s15 = smov [#allocation8]   ;;  %s1488_s17 = smov [#allocation2]  }
  0x15   :  { %s59_s16 = sshll.u32 %s1487_s15, 4  ;;  %s21_s18 = sshll.u32 %s1488_s17, 4  ;;  %s60_s16 = int_to_ptr.vmem [resolvable:$true] %s59_s16  ;;  %s22_s18 = int_to_ptr.vmem [resolvable:$true] %s21_s18 }
  0x16   :  { %s1366_s21 = scalar_lea.hbm %s1740_s4, 2048 }
  0x17   :  { %p1367_p8 = scmp.ne.s32.totalorder %s1740_s4, %s1366_s21  ;;  %p1370_p9 = scmp.lt.u32.totalorder %s1366_s21, %s1740_s4 }
  0x19   :  { %p1372_p10 = pnand %p1370_p9, %p1367_p8 }
  0x1b   :  { %1375 = shalt.err (!%p1372_p10)
}
  0x1c   :  { %s1376_s1 = scalar_lea.vmem %s60_s16, 2048  ;;  %p1381_p12 = scmp.lt.s32.totalorder %s60_s16, %s60_s16 }
  0x1d   :  { %p1377_p11 = scmp.ne.s32.totalorder %s60_s16, %s1376_s1  ;;  %p1382_p13 = scmp.lt.s32.totalorder %s1376_s1, %s1376_s1 }
  0x1f   :  { %p1383_p0 = por %p1382_p13, %p1381_p12 }
  0x21   :  { %p1384_p1 = pnand %p1383_p0, %p1377_p11 }
  0x23   :  { %1387 = shalt.err (!%p1384_p1)
}
  0x24   :  { %s1489_s25 = smov 128   ;;  %s1490_s27 = smov 8  }
  0x25   :  { %65 = dma.hbm_to_vmem [thread:$0]  %s1740_s4, 2048, %s60_s16, [#allocation9], %s1489_s25, %s1489_s25, %s1490_s27  }
  0x26   :  { %s1388_s9 = scalar_lea.hbm %s1736_s0, 512 }
  0x27   :  { %p1389_p2 = scmp.ne.s32.totalorder %s1736_s0, %s1388_s9  ;;  %p1392_p3 = scmp.lt.u32.totalorder %s1388_s9, %s1736_s0 }
  0x29   :  { %p1394_p4 = pnand %p1392_p3, %p1389_p2 }
  0x2b   :  { %1397 = shalt.err (!%p1394_p4)
}
  0x2c   :  { %s1398_s17 = scalar_lea.vmem %s22_s18, 512  ;;  %p1403_p6 = scmp.lt.s32.totalorder %s22_s18, %s22_s18 }
  0x2d   :  { %p1399_p5 = scmp.ne.s32.totalorder %s22_s18, %s1398_s17  ;;  %p1404_p7 = scmp.lt.s32.totalorder %s1398_s17, %s1398_s17 }
  0x2f   :  { %p1405_p8 = por %p1404_p7, %p1403_p6 }
  0x31   :  { %p1406_p9 = pnand %p1405_p8, %p1399_p5 }
  0x33   :  { %1409 = shalt.err (!%p1406_p9)
}
  0x34   :  { %27 = dma.hbm_to_vmem [thread:$0]  %s1736_s0, 512, %s22_s18, [#allocation3], %s1485_s11, %s1485_s11, %s1486_s12  }
  0x35   :  { %s1491_s19 = smov [#allocation7]   ;;  %s1492_s21 = smov [#allocation10]  }
  0x36   :  { %s45_s20 = sshll.u32 %s1491_s19, 4  ;;  %s73_s22 = sshll.u32 %s1492_s21, 4  ;;  %s46_s20 = int_to_ptr.vmem [resolvable:$true] %s45_s20  ;;  %s74_s22 = int_to_ptr.vmem [resolvable:$true] %s73_s22 }
  0x37   :  { %s1410_s26 = scalar_lea.hbm %s1738_s2, 2048 }
  0x38   :  { %p1411_p10 = scmp.ne.s32.totalorder %s1738_s2, %s1410_s26  ;;  %p1414_p11 = scmp.lt.u32.totalorder %s1410_s26, %s1738_s2 }
  0x3a   :  { %p1416_p12 = pnand %p1414_p11, %p1411_p10 }
  0x3c   :  { %1419 = shalt.err (!%p1416_p12)
}
  0x3d   :  { %s1420_s0 = scalar_lea.vmem %s46_s20, 2048  ;;  %p1425_p0 = scmp.lt.s32.totalorder %s46_s20, %s46_s20 }
  0x3e   :  { %p1421_p13 = scmp.ne.s32.totalorder %s46_s20, %s1420_s0  ;;  %p1426_p1 = scmp.lt.s32.totalorder %s1420_s0, %s1420_s0 }
  0x40   :  { %p1427_p2 = por %p1426_p1, %p1425_p0 }
  0x42   :  { %p1428_p3 = pnand %p1427_p2, %p1421_p13 }
  0x44   :  { %1431 = shalt.err (!%p1428_p3)
}
  0x45   :  { %51 = dma.hbm_to_vmem [thread:$0]  %s1738_s2, 2048, %s46_s20, [#allocation6], %s1489_s25, %s1489_s25, %s1490_s27  }
  0x46   :  { %s1432_s9 = scalar_lea.hbm %s1742_s6, 2048 }
  0x47   :  { %p1433_p4 = scmp.ne.s32.totalorder %s1742_s6, %s1432_s9  ;;  %p1436_p5 = scmp.lt.u32.totalorder %s1432_s9, %s1742_s6 }
  0x49   :  { %p1438_p6 = pnand %p1436_p5, %p1433_p4 }
  0x4b   :  { %1441 = shalt.err (!%p1438_p6)
}
  0x4c   :  { %s1442_s17 = scalar_lea.vmem %s74_s22, 2048  ;;  %p1447_p8 = scmp.lt.s32.totalorder %s74_s22, %s74_s22 }
  0x4d   :  { %p1443_p7 = scmp.ne.s32.totalorder %s74_s22, %s1442_s17  ;;  %p1448_p9 = scmp.lt.s32.totalorder %s1442_s17, %s1442_s17 }
  0x4f   :  { %p1449_p10 = por %p1448_p9, %p1447_p8 }
  0x51   :  { %p1450_p11 = pnand %p1449_p10, %p1443_p7 }
  0x53   :  { %1453 = shalt.err (!%p1450_p11)
}
  0x54   :  { %79 = dma.hbm_to_vmem [thread:$0]  %s1742_s6, 2048, %s74_s22, [#allocation9], %s1489_s25, %s1489_s25, %s1490_s27  }
  0x55   :  { %1476 = dma.done.wait [#allocation3], 512  }
  0x56   :  { %1477 = vsyncadd [#allocation3], 4294966784 }
  0x57   :  { %1478 = dma.done.wait [#allocation6], 2560  }
  0x58   :  { %1479 = vsyncadd [#allocation6], 4294964736 }
  0x59   :  { %1480 = dma.done.wait [#allocation9], 4096  }
  0x5a   :  { %1481 = vsyncadd [#allocation9], 4294963200  ;;  %v1493_v0 = vmov 0   ;;  %v1232_v1 = vld [vmem:[#allocation7 + $0x4] ss:$8 sps:$4 sm:$0xff]   ;;  %v1258_v19 = vld [vmem:[#allocation5 + $0x10] sm:$0xff]  }
  0x5b   :  { %265 = vmatprep.mubr.bf16.mxu0 %v1493_v0  ;;  %v1234_v2 = vld [vmem:[#allocation7] ss:$8 sps:$4 sm:$0xff]   ;;  %233 = vmatprep.subr.bf16.mxu0 %v1232_v1  ;;  %v1235_v3 = vld [vmem:[#allocation7 + $0x14] ss:$8 sps:$4 sm:$0xff]   ;;  %v1237_v4 = vld [vmem:[#allocation7 + $0x10] ss:$8 sps:$4 sm:$0xff]  }
  0x5c   :  { %234 = vmatpush1.bf16.msra.mxu0 %v1234_v2  ;;  %v1238_v5 = vld [vmem:[#allocation7 + $0x24] ss:$8 sps:$4 sm:$0xff]   ;;  %v1240_v6 = vld [vmem:[#allocation7 + $0x20] ss:$8 sps:$4 sm:$0xff]   ;;  %v1241_v7 = vld [vmem:[#allocation7 + $0x34] ss:$8 sps:$4 sm:$0xff]  }
  0x5d   :  { %235 = vmatprep.subr.bf16.mxu0 %v1235_v3  ;;  %v1243_v8 = vld [vmem:[#allocation7 + $0x30] ss:$8 sps:$4 sm:$0xff]   ;;  %v1244_v9 = vld [vmem:[#allocation7 + $0x44] ss:$8 sps:$4 sm:$0xff]   ;;  %v1246_v10 = vld [vmem:[#allocation7 + $0x40] ss:$8 sps:$4 sm:$0xff]  }
  0x5e   :  { %v1247_v11 = vld [vmem:[#allocation7 + $0x54] ss:$8 sps:$4 sm:$0xff]   ;;  %v1249_v12 = vld [vmem:[#allocation7 + $0x50] ss:$8 sps:$4 sm:$0xff]   ;;  %v1250_v13 = vld [vmem:[#allocation7 + $0x64] ss:$8 sps:$4 sm:$0xff]  }
  0x5f   :  { %v1252_v14 = vld [vmem:[#allocation7 + $0x60] ss:$8 sps:$4 sm:$0xff]   ;;  %v1253_v15 = vld [vmem:[#allocation7 + $0x74] ss:$8 sps:$4 sm:$0xff]   ;;  %v1255_v16 = vld [vmem:[#allocation7 + $0x70] ss:$8 sps:$4 sm:$0xff]  }
  0x60   :  { %236 = vmatpush1.bf16.msra.mxu0 %v1237_v4  ;;  %v1256_v17 = vld [vmem:[#allocation5] sm:$0xff]   ;;  %v1257_v18 = vld [vmem:[#allocation5 + $0x8] sm:$0xff]   ;;  %v1259_v20 = vld [vmem:[#allocation5 + $0x18] sm:$0xff]   ;;  %vm330_vm0 = vcmask 523264  }
  0x61   :  { %237 = vmatprep.subr.bf16.mxu0 %v1238_v5  ;;  %v1614_v21 = vld [vmem:[#allocation2] sm:$0xff]   ;;  %v1634_v43 = vld [vmem:[#allocation2 + $0x8] sm:$0xff]   ;;  %v1636_v44 = vld [vmem:[#allocation2 + $0x10] sm:$0xff]  }
  0x62   :  { %1181 = vmatprep.mubr.msk.bf16.mxu1 %vm330_vm0, %v1614_v21  ;;  %v1266_v42 = vld [vmem:[#allocation8 + $0x4] ss:$8 sps:$4 sm:$0xff]   ;;  %v1264_v45 = vld [vmem:[#allocation8] ss:$8 sps:$4 sm:$0xff]   ;;  %v1269_v46 = vld [vmem:[#allocation8 + $0x14] ss:$8 sps:$4 sm:$0xff]  }
  0x63   :  { %v1267_v47 = vld [vmem:[#allocation8 + $0x10] ss:$8 sps:$4 sm:$0xff]   ;;  %v1272_v48 = vld [vmem:[#allocation8 + $0x24] ss:$8 sps:$4 sm:$0xff]   ;;  %v1270_v50 = vld [vmem:[#allocation8 + $0x20] ss:$8 sps:$4 sm:$0xff]  }
  0x64   :  { %238 = vmatpush1.bf16.msra.mxu0 %v1240_v6  ;;  %v1642_v49 = vld [vmem:[#allocation2 + $0x18] sm:$0xff]   ;;  %v1278_v53 = vld [vmem:[#allocation8 + $0x44] ss:$8 sps:$4 sm:$0xff]   ;;  %v1276_v54 = vld [vmem:[#allocation8 + $0x40] ss:$8 sps:$4 sm:$0xff]  }
  0x65   :  { %239 = vmatprep.subr.bf16.mxu0 %v1241_v7  ;;  %v1275_v51 = vld [vmem:[#allocation8 + $0x34] ss:$8 sps:$4 sm:$0xff]   ;;  %v1273_v52 = vld [vmem:[#allocation8 + $0x30] ss:$8 sps:$4 sm:$0xff]   ;;  %v1284_v57 = vld [vmem:[#allocation8 + $0x64] ss:$8 sps:$4 sm:$0xff]  }
  0x66   :  { %v1281_v55 = vld [vmem:[#allocation8 + $0x54] ss:$8 sps:$4 sm:$0xff]   ;;  %v1279_v56 = vld [vmem:[#allocation8 + $0x50] ss:$8 sps:$4 sm:$0xff]   ;;  %v1282_v58 = vld [vmem:[#allocation8 + $0x60] ss:$8 sps:$4 sm:$0xff]  }
  0x67   :  { %v1287_v59 = vld [vmem:[#allocation8 + $0x74] ss:$8 sps:$4 sm:$0xff]   ;;  %v1285_v60 = vld [vmem:[#allocation8 + $0x70] ss:$8 sps:$4 sm:$0xff]   ;;  %v1107_v61 = vld [vmem:[%s1739_s3] ss:$0 sm:$0xff] }
  0x68   :  { %240 = vmatpush1.bf16.msra.mxu0 %v1243_v8 }
  0x69   :  { %241 = vmatprep.subr.bf16.mxu0 %v1244_v9 }
  0x6c   :  { %242 = vmatpush1.bf16.msra.mxu0 %v1246_v10 }
  0x6d   :  { %243 = vmatprep.subr.bf16.mxu0 %v1247_v11 }
  0x70   :  { %244 = vmatpush1.bf16.msra.mxu0 %v1249_v12 }
  0x71   :  { %245 = vmatprep.subr.bf16.mxu0 %v1250_v13 }
  0x74   :  { %246 = vmatpush1.bf16.msra.mxu0 %v1252_v14 }
  0x75   :  { %247 = vmatprep.subr.bf16.mxu0 %v1253_v15 }
  0x78   :  { %248 = vmatpush1.bf16.msra.mxu0 %v1255_v16 }
  0x7b   :  { %266 = vmatmul.mubr.bf16.vlgmr.msra.gmra.mrb[0].mxu0 %v1256_v17 }
  0x7c   :  { %275 = vmatprep.mubr.bf16.mxu0 %v1493_v0 }
  0x83   :  { %276 = vmatmul.mubr.bf16.gmra.mrb[4].mxu0 %v1257_v18 }
  0x84   :  { %285 = vmatprep.mubr.bf16.mxu0 %v1493_v0 }
  0x8b   :  { %286 = vmatmul.mubr.bf16.gmra.mrb[8].mxu0 %v1258_v19 }
  0x8c   :  { %295 = vmatprep.mubr.bf16.mxu0 %v1493_v0 }
  0x93   :  { %296 = vmatmul.mubr.bf16.gmra.mrb[12].mxu0 %v1259_v20 }
  0x94   :  { %1197 = vmatprep.mubr.msk.bf16.mxu0 %vm330_vm0, %v1614_v21 }
 0x14e   :  { %v1620_v22 = vpop.f32.mrb[0].mxu0 }
 0x14f   :  { %v269_v23 = vpop.f32.mrb[1].mxu0 }
 0x150   :  { %v1622_v24 = vpop.f32.mrb[2].mxu0 }
 0x151   :  { %v273_v25 = vpop.f32.mrb[3].mxu0 }
 0x152   :  { %v306_v26 = vpack.c.bf16 %v273_v25, %v269_v23 }
 0x154   :  { %1173 = vmatprep.subr.bf16.mxu1 %v306_v26 }
 0x155   :  { %1174 = vmatpush3.bf16.msra.mxu1 %v306_v26 }
 0x156   :  { %v277_v27 = vpop.f32.mrb[4].mxu0 }
 0x157   :  { %v279_v28 = vpop.f32.mrb[5].mxu0 }
 0x158   :  { %v1624_v29 = vpop.f32.mrb[6].mxu0 }
 0x159   :  { %v283_v30 = vpop.f32.mrb[7].mxu0 }
 0x15a   :  { %v307_v31 = vpack.c.bf16 %v283_v30, %v279_v28 }
 0x15c   :  { %1175 = vmatprep.subr.bf16.mxu1 %v307_v31 }
 0x15d   :  { %1176 = vmatpush3.bf16.msra.mxu1 %v307_v31 }
 0x15e   :  { %v1626_v32 = vpop.f32.mrb[8].mxu0 }
 0x15f   :  { %v289_v33 = vpop.f32.mrb[9].mxu0 }
 0x160   :  { %v1628_v34 = vpop.f32.mrb[10].mxu0 }
 0x161   :  { %v293_v35 = vpop.f32.mrb[11].mxu0 }
 0x162   :  { %v308_v36 = vpack.c.bf16 %v293_v35, %v289_v33 }
 0x164   :  { %1177 = vmatprep.subr.bf16.mxu1 %v308_v36 }
 0x165   :  { %1178 = vmatpush3.bf16.msra.mxu1 %v308_v36 }
 0x166   :  { %v1630_v37 = vpop.f32.mrb[12].mxu0 }
 0x167   :  { %v299_v38 = vpop.f32.mrb[13].mxu0 }
 0x168   :  { %v1632_v39 = vpop.f32.mrb[14].mxu0 }
 0x169   :  { %v303_v40 = vpop.f32.mrb[15].mxu0 }
 0x16a   :  { %v309_v41 = vpack.c.bf16 %v303_v40, %v299_v38  ;;  %v1293_v38 = vld [vmem:[#allocation10 + $0x14] ss:$8 sps:$4 sm:$0xff]   ;;  %v1296_v40 = vld [vmem:[#allocation10 + $0x24] ss:$8 sps:$4 sm:$0xff]  }
 0x16c   :  { %1179 = vmatprep.subr.bf16.mxu1 %v309_v41 }
 0x16d   :  { %1180 = vmatpush3.bf16.msra.mxu1 %v309_v41  ;;  %v1294_v41 = vld [vmem:[#allocation10 + $0x20] ss:$8 sps:$4 sm:$0xff]  }
 0x16e   :  { %539 = vmatprep.subr.bf16.mxu1 %v1266_v42  ;;  %v1299_v42 = vld [vmem:[#allocation10 + $0x34] ss:$8 sps:$4 sm:$0xff]  }
 0x170   :  { %1182 = vmatmul.mubr.msk.bf16.vlgmr.msra.gmra.mrb[0].mxu1 %vm330_vm0, %v1634_v43 }
 0x171   :  { %1185 = vmatprep.mubr.msk.bf16.mxu1 %vm330_vm0, %v1636_v44  ;;  %540 = vmatpush1.bf16.msra.mxu1 %v1264_v45  ;;  %v1297_v45 = vld [vmem:[#allocation10 + $0x30] ss:$8 sps:$4 sm:$0xff]  }
 0x172   :  { %541 = vmatprep.subr.bf16.mxu1 %v1269_v46  ;;  %v1302_v46 = vld [vmem:[#allocation10 + $0x44] ss:$8 sps:$4 sm:$0xff]  }
 0x175   :  { %542 = vmatpush1.bf16.msra.mxu1 %v1267_v47  ;;  %v1300_v47 = vld [vmem:[#allocation10 + $0x40] ss:$8 sps:$4 sm:$0xff]  }
 0x176   :  { %543 = vmatprep.subr.bf16.mxu1 %v1272_v48 }
 0x178   :  { %1186 = vmatmul.mubr.msk.bf16.gmra.mrb[4].mxu1 %vm330_vm0, %v1642_v49 }
 0x179   :  { %544 = vmatpush1.bf16.msra.mxu1 %v1270_v50  ;;  %571 = vmatprep.mubr.bf16.mxu1 %v1493_v0 }
 0x17a   :  { %545 = vmatprep.subr.bf16.mxu1 %v1275_v51 }
 0x17d   :  { %546 = vmatpush1.bf16.msra.mxu1 %v1273_v52 }
 0x17e   :  { %547 = vmatprep.subr.bf16.mxu1 %v1278_v53 }
 0x181   :  { %548 = vmatpush1.bf16.msra.mxu1 %v1276_v54 }
 0x182   :  { %549 = vmatprep.subr.bf16.mxu1 %v1281_v55 }
 0x185   :  { %550 = vmatpush1.bf16.msra.mxu1 %v1279_v56 }
 0x186   :  { %551 = vmatprep.subr.bf16.mxu1 %v1284_v57 }
 0x189   :  { %552 = vmatpush1.bf16.msra.mxu1 %v1282_v58 }
 0x18a   :  { %553 = vmatprep.subr.bf16.mxu1 %v1287_v59 }
 0x18d   :  { %554 = vmatpush1.bf16.msra.mxu1 %v1285_v60 }
 0x243   :  { %v1183_v62 = vpop.f32.mrb[0].mxu1 }
 0x244   :  { %v410_v63 = vadd.f32 %v1183_v62, %v277_v27  ;;  %v377_v1 = vpop.f32.mrb[1].mxu1 }
 0x245   :  { %v408_v2 = vadd.f32 %v377_v1, %v1620_v22  ;;  %v1184_v3 = vpop.f32.mrb[2].mxu1 }
 0x246   :  { %v424_v4 = vadd.f32 %v1107_v61, %v410_v63  ;;  %v411_v5 = vadd.f32 %v1184_v3, %v1624_v29  ;;  %v380_v6 = vpop.f32.mrb[3].mxu1 }
 0x247   :  { %v422_v7 = vadd.f32 %v1107_v61, %v408_v2  ;;  %v409_v8 = vadd.f32 %v380_v6, %v1622_v24  ;;  %v1305_v6 = vld [vmem:[#allocation10 + $0x54] ss:$8 sps:$4 sm:$0xff]  }
 0x248   :  { %v425_v9 = vadd.f32 %v1107_v61, %v411_v5  ;;  %v432_v11 = vmax.f32 %v424_v4, 0.0 }
 0x249   :  { %v423_v10 = vadd.f32 %v1107_v61, %v409_v8  ;;  %v430_v13 = vmax.f32 %v422_v7, 0.0  ;;  %v1303_v7 = vld [vmem:[#allocation10 + $0x50] ss:$8 sps:$4 sm:$0xff]   ;;  %v1308_v8 = vld [vmem:[#allocation10 + $0x64] ss:$8 sps:$4 sm:$0xff]  }
 0x24a   :  { %v433_v12 = vmax.f32 %v425_v9, 0.0  ;;  %v1306_v9 = vld [vmem:[#allocation10 + $0x60] ss:$8 sps:$4 sm:$0xff]  }
 0x24b   :  { %v431_v14 = vmax.f32 %v423_v10, 0.0  ;;  %v1187_v15 = vpop.f32.mrb[4].mxu1  ;;  %v1311_v10 = vld [vmem:[#allocation10 + $0x74] ss:$8 sps:$4 sm:$0xff]  }
 0x24c   :  { %v414_v16 = vadd.f32 %v1187_v15, %v1630_v37  ;;  %v393_v17 = vpop.f32.mrb[5].mxu1  ;;  %v439_v18 = vpack.c.bf16 %v433_v12, %v432_v11  ;;  %v1309_v11 = vld [vmem:[#allocation10 + $0x70] ss:$8 sps:$4 sm:$0xff]   ;;  %v1128_v12 = vld [vmem:[%s1741_s5] ss:$0 sm:$0xff]  ;;  %s1494_s5 = smov [#allocation11]  }
 0x24d   :  { %v438_v19 = vpack.c.bf16 %v431_v14, %v430_v13  ;;  %v412_v20 = vadd.f32 %v393_v17, %v1626_v32  ;;  %v1188_v22 = vpop.f32.mrb[6].mxu1  ;;  %v1288_v32 = vld [vmem:[#allocation10] ss:$8 sps:$4 sm:$0xff]   ;;  %s1065_s20 = sshll.u32 %s1494_s5, 4  ;;  %s1066_s20 = int_to_ptr.vmem [resolvable:$true] %s1065_s20 }
 0x24e   :  { %v428_v23 = vadd.f32 %v1107_v61, %v414_v16  ;;  %v415_v25 = vadd.f32 %v1188_v22, %v1632_v39  ;;  %v396_v26 = vpop.f32.mrb[7].mxu1  ;;  %v1291_v39 = vld [vmem:[#allocation10 + $0x10] ss:$8 sps:$4 sm:$0xff]   ;;  %s1454_s21 = scalar_lea.vmem %s1066_s20, 1024  ;;  %p1459_p13 = scmp.lt.s32.totalorder %s1066_s20, %s1066_s20 }
 0x24f   :  { %v426_v24 = vadd.f32 %v1107_v61, %v412_v20  ;;  %v413_v27 = vadd.f32 %v396_v26, %v1628_v34  ;;  %572 = vmatmul.mubr.bf16.vlgmr.msra.gmra.mrb[8].mxu1 %v438_v19  ;;  %v1290_v34 = vld [vmem:[#allocation10 + $0x4] ss:$8 sps:$4 sm:$0xff]   ;;  %p1455_p12 = scmp.ne.s32.totalorder %s1066_s20, %s1454_s21  ;;  %p1460_p0 = scmp.lt.s32.totalorder %s1454_s21, %s1454_s21 }
 0x250   :  { %v429_v28 = vadd.f32 %v1107_v61, %v415_v25  ;;  %581 = vmatprep.mubr.bf16.mxu1 %v1493_v0  ;;  %v436_v30 = vmax.f32 %v428_v23, 0.0  ;;  %811 = vmatprep.subr.bf16.mxu1 %v1290_v34 }
 0x251   :  { %v427_v29 = vadd.f32 %v1107_v61, %v413_v27  ;;  %v434_v33 = vmax.f32 %v426_v24, 0.0  ;;  %812 = vmatpush1.bf16.msra.mxu1 %v1288_v32  ;;  %p1461_p1 = por %p1460_p0, %p1459_p13 }
 0x252   :  { %v437_v31 = vmax.f32 %v429_v28, 0.0  ;;  %813 = vmatprep.subr.bf16.mxu1 %v1293_v38 }
 0x253   :  { %v435_v35 = vmax.f32 %v427_v29, 0.0  ;;  %p1462_p2 = pnand %p1461_p1, %p1455_p12 }
 0x254   :  { %v441_v36 = vpack.c.bf16 %v437_v31, %v436_v30 }
 0x255   :  { %v440_v37 = vpack.c.bf16 %v435_v35, %v434_v33  ;;  %814 = vmatpush1.bf16.msra.mxu1 %v1291_v39 }
 0x256   :  { %815 = vmatprep.subr.bf16.mxu1 %v1296_v40 }
 0x257   :  { %582 = vmatmul.mubr.bf16.gmra.mrb[12].mxu1 %v439_v18 }
 0x258   :  { %591 = vmatprep.mubr.bf16.mxu1 %v1493_v0 }
 0x259   :  { %816 = vmatpush1.bf16.msra.mxu1 %v1294_v41 }
 0x25a   :  { %817 = vmatprep.subr.bf16.mxu1 %v1299_v42 }
 0x25d   :  { %818 = vmatpush1.bf16.msra.mxu1 %v1297_v45 }
 0x25e   :  { %819 = vmatprep.subr.bf16.mxu1 %v1302_v46 }
 0x25f   :  { %592 = vmatmul.mubr.bf16.gmra.mrb[16].mxu1 %v440_v37 }
 0x260   :  { %601 = vmatprep.mubr.bf16.mxu1 %v1493_v0 }
 0x261   :  { %820 = vmatpush1.bf16.msra.mxu1 %v1300_v47 }
 0x262   :  { %821 = vmatprep.subr.bf16.mxu1 %v1305_v6 }
 0x265   :  { %822 = vmatpush1.bf16.msra.mxu1 %v1303_v7 }
 0x266   :  { %823 = vmatprep.subr.bf16.mxu1 %v1308_v8  ;;  %v961_v8 = vlaneseq }
 0x267   :  { %602 = vmatmul.mubr.bf16.gmra.mrb[20].mxu1 %v441_v36 }
 0x268   :  { %843 = vmatprep.mubr.bf16.mxu1 %v1493_v0 }
 0x269   :  { %824 = vmatpush1.bf16.msra.mxu1 %v1306_v9  ;;  %v962_v9 = vand.u32 127, %v961_v8 }
 0x26a   :  { %825 = vmatprep.subr.bf16.mxu1 %v1311_v10 }
 0x26b   :  { %vm963_vm1 = vcmp.lt.s32.totalorder %v962_v9, 16 }
 0x26d   :  { %826 = vmatpush1.bf16.msra.mxu1 %v1309_v11 }
 0x322   :  { %v573_v48 = vpop.f32.mrb[8].mxu1 }
 0x323   :  { %v575_v50 = vpop.f32.mrb[9].mxu1 }
 0x324   :  { %v577_v51 = vpop.f32.mrb[10].mxu1 }
 0x325   :  { %v579_v52 = vpop.f32.mrb[11].mxu1 }
 0x326   :  { %v612_v53 = vpack.c.bf16 %v579_v52, %v575_v50 }
 0x328   :  { %1189 = vmatprep.subr.bf16.mxu0 %v612_v53 }
 0x329   :  { %1190 = vmatpush3.bf16.msra.mxu0 %v612_v53 }
 0x32a   :  { %v583_v54 = vpop.f32.mrb[12].mxu1 }
 0x32b   :  { %v585_v55 = vpop.f32.mrb[13].mxu1 }
 0x32c   :  { %v587_v56 = vpop.f32.mrb[14].mxu1 }
 0x32d   :  { %v589_v57 = vpop.f32.mrb[15].mxu1 }
 0x32e   :  { %v613_v58 = vpack.c.bf16 %v589_v57, %v585_v55 }
 0x330   :  { %1191 = vmatprep.subr.bf16.mxu0 %v613_v58 }
 0x331   :  { %1192 = vmatpush3.bf16.msra.mxu0 %v613_v58 }
 0x332   :  { %v593_v59 = vpop.f32.mrb[16].mxu1 }
 0x333   :  { %v595_v60 = vpop.f32.mrb[17].mxu1 }
 0x334   :  { %v597_v61 = vpop.f32.mrb[18].mxu1 }
 0x335   :  { %v599_v62 = vpop.f32.mrb[19].mxu1 }
 0x336   :  { %v614_v63 = vpack.c.bf16 %v599_v62, %v595_v60 }
 0x338   :  { %1193 = vmatprep.subr.bf16.mxu0 %v614_v63 }
 0x339   :  { %1194 = vmatpush3.bf16.msra.mxu0 %v614_v63 }
 0x33a   :  { %v603_v1 = vpop.f32.mrb[20].mxu1 }
 0x33b   :  { %v605_v2 = vpop.f32.mrb[21].mxu1 }
 0x33c   :  { %v607_v3 = vpop.f32.mrb[22].mxu1 }
 0x33d   :  { %v609_v4 = vpop.f32.mrb[23].mxu1 }
 0x33e   :  { %v615_v5 = vpack.c.bf16 %v609_v4, %v605_v2 }
 0x340   :  { %1195 = vmatprep.subr.bf16.mxu0 %v615_v5 }
 0x341   :  { %1196 = vmatpush3.bf16.msra.mxu0 %v615_v5 }
 0x344   :  { %1198 = vmatmul.mubr.msk.bf16.vlgmr.msra.gmra.mrb[16].mxu0 %vm330_vm0, %v1634_v43 }
 0x345   :  { %1201 = vmatprep.mubr.msk.bf16.mxu0 %vm330_vm0, %v1636_v44 }
 0x34c   :  { %1202 = vmatmul.mubr.msk.bf16.gmra.mrb[20].mxu0 %vm330_vm0, %v1642_v49 }
 0x34d   :  { %1213 = vmatprep.mubr.msk.bf16.mxu0 %vm330_vm0, %v1614_v21 }
 0x417   :  { %v1199_v13 = vpop.f32.mrb[16].mxu0 }
 0x418   :  { %v683_v14 = vadd.f32 %v1199_v13, %v583_v54  ;;  %v650_v15 = vpop.f32.mrb[17].mxu0 }
 0x419   :  { %v681_v21 = vadd.f32 %v650_v15, %v573_v48  ;;  %v1200_v16 = vpop.f32.mrb[18].mxu0 }
 0x41a   :  { %v697_v17 = vadd.f32 %v1128_v12, %v683_v14  ;;  %v684_v18 = vadd.f32 %v1200_v16, %v587_v56  ;;  %v653_v19 = vpop.f32.mrb[19].mxu0 }
 0x41b   :  { %v695_v20 = vadd.f32 %v1128_v12, %v681_v21  ;;  %v682_v22 = vadd.f32 %v653_v19, %v577_v51 }
 0x41c   :  { %v698_v23 = vadd.f32 %v1128_v12, %v684_v18  ;;  %v705_v26 = vmax.f32 %v697_v17, 0.0 }
 0x41d   :  { %v696_v25 = vadd.f32 %v1128_v12, %v682_v22  ;;  %v703_v27 = vmax.f32 %v695_v20, 0.0 }
 0x41e   :  { %v706_v24 = vmax.f32 %v698_v23, 0.0 }
 0x41f   :  { %v704_v28 = vmax.f32 %v696_v25, 0.0  ;;  %v1203_v29 = vpop.f32.mrb[20].mxu0 }
 0x420   :  { %v687_v30 = vadd.f32 %v1203_v29, %v603_v1  ;;  %v666_v31 = vpop.f32.mrb[21].mxu0  ;;  %v712_v33 = vpack.c.bf16 %v706_v24, %v705_v26 }
 0x421   :  { %v711_v35 = vpack.c.bf16 %v704_v28, %v703_v27  ;;  %v685_v36 = vadd.f32 %v666_v31, %v593_v59  ;;  %v1204_v37 = vpop.f32.mrb[22].mxu0 }
 0x422   :  { %v701_v32 = vadd.f32 %v1128_v12, %v687_v30  ;;  %v688_v34 = vadd.f32 %v1204_v37, %v607_v3  ;;  %v669_v38 = vpop.f32.mrb[23].mxu0 }
 0x423   :  { %v699_v39 = vadd.f32 %v1128_v12, %v685_v36  ;;  %v686_v40 = vadd.f32 %v669_v38, %v597_v61  ;;  %844 = vmatmul.mubr.bf16.vlgmr.msra.gmra.mrb[24].mxu1 %v711_v35 }
 0x424   :  { %v702_v41 = vadd.f32 %v1128_v12, %v688_v34  ;;  %853 = vmatprep.mubr.bf16.mxu1 %v1493_v0  ;;  %v709_v45 = vmax.f32 %v701_v32, 0.0 }
 0x425   :  { %v700_v42 = vadd.f32 %v1128_v12, %v686_v40  ;;  %v707_v47 = vmax.f32 %v699_v39, 0.0 }
 0x426   :  { %v710_v46 = vmax.f32 %v702_v41, 0.0 }
 0x427   :  { %v708_v48 = vmax.f32 %v700_v42, 0.0 }
 0x428   :  { %v714_v50 = vpack.c.bf16 %v710_v46, %v709_v45 }
 0x429   :  { %v713_v51 = vpack.c.bf16 %v708_v48, %v707_v47 }
 0x42b   :  { %854 = vmatmul.mubr.bf16.gmra.mrb[28].mxu1 %v712_v33 }
 0x42c   :  { %863 = vmatprep.mubr.bf16.mxu1 %v1493_v0 }
 0x433   :  { %864 = vmatmul.mubr.bf16.gmra.mrb[32].mxu1 %v713_v51 }
 0x434   :  { %873 = vmatprep.mubr.bf16.mxu1 %v1493_v0 }
 0x43b   :  { %874 = vmatmul.mubr.bf16.gmra.mrb[36].mxu1 %v714_v50 }
 0x4f6   :  { %v845_v52 = vpop.f32.mrb[24].mxu1 }
 0x4f7   :  { %v847_v53 = vpop.f32.mrb[25].mxu1 }
 0x4f8   :  { %v849_v54 = vpop.f32.mrb[26].mxu1 }
 0x4f9   :  { %v851_v55 = vpop.f32.mrb[27].mxu1 }
 0x4fa   :  { %v884_v56 = vpack.c.bf16 %v851_v55, %v847_v53 }
 0x4fc   :  { %1205 = vmatprep.subr.bf16.mxu0 %v884_v56 }
 0x4fd   :  { %1206 = vmatpush3.bf16.msra.mxu0 %v884_v56 }
 0x4fe   :  { %v855_v57 = vpop.f32.mrb[28].mxu1 }
 0x4ff   :  { %v857_v58 = vpop.f32.mrb[29].mxu1 }
 0x500   :  { %v859_v59 = vpop.f32.mrb[30].mxu1 }
 0x501   :  { %v861_v60 = vpop.f32.mrb[31].mxu1 }
 0x502   :  { %v885_v61 = vpack.c.bf16 %v861_v60, %v857_v58 }
 0x504   :  { %1207 = vmatprep.subr.bf16.mxu0 %v885_v61 }
 0x505   :  { %1208 = vmatpush3.bf16.msra.mxu0 %v885_v61 }
 0x506   :  { %v865_v62 = vpop.f32.mrb[32].mxu1 }
 0x507   :  { %v867_v63 = vpop.f32.mrb[33].mxu1 }
 0x508   :  { %v869_v1 = vpop.f32.mrb[34].mxu1 }
 0x509   :  { %v871_v2 = vpop.f32.mrb[35].mxu1 }
 0x50a   :  { %v886_v0 = vpack.c.bf16 %v871_v2, %v867_v63 }
 0x50c   :  { %1209 = vmatprep.subr.bf16.mxu0 %v886_v0 }
 0x50d   :  { %1210 = vmatpush3.bf16.msra.mxu0 %v886_v0 }
 0x50e   :  { %v875_v3 = vpop.f32.mrb[36].mxu1 }
 0x50f   :  { %v877_v4 = vpop.f32.mrb[37].mxu1 }
 0x510   :  { %v879_v5 = vpop.f32.mrb[38].mxu1 }
 0x511   :  { %v881_v6 = vpop.f32.mrb[39].mxu1 }
 0x512   :  { %v887_v7 = vpack.c.bf16 %v881_v6, %v877_v4 }
 0x514   :  { %1211 = vmatprep.subr.bf16.mxu0 %v887_v7 }
 0x515   :  { %1212 = vmatpush3.bf16.msra.mxu0 %v887_v7 }
 0x518   :  { %1214 = vmatmul.mubr.msk.bf16.vlgmr.msra.gmra.mrb[24].mxu0 %vm330_vm0, %v1634_v43 }
 0x519   :  { %1217 = vmatprep.mubr.msk.bf16.mxu0 %vm330_vm0, %v1636_v44 }
 0x520   :  { %1218 = vmatmul.mubr.msk.bf16.gmra.mrb[28].mxu0 %vm330_vm0, %v1642_v49 }
 0x5eb   :  { %v1215_v10 = vpop.f32.mrb[24].mxu0 }
 0x5ec   :  { %v955_v11 = vadd.f32 %v1215_v10, %v855_v57  ;;  %v922_v12 = vpop.f32.mrb[25].mxu0 }
 0x5ed   :  { %v953_v13 = vadd.f32 %v922_v12, %v845_v52  ;;  %v1216_v14 = vpop.f32.mrb[26].mxu0 }
 0x5ee   :  { %v956_v15 = vadd.f32 %v1216_v14, %v859_v59  ;;  %v925_v21 = vpop.f32.mrb[27].mxu0  ;;  %v966_v16 = vsel %vm963_vm1, %v955_v11, -inf }
 0x5ef   :  { %v954_v17 = vadd.f32 %v925_v21, %v849_v54  ;;  %976 = vmax.xlane.f32.xlu1 %v966_v16  ;;  %v964_v43 = vsel %vm963_vm1, %v953_v13, -inf }
 0x5f0   :  { %972 = vmax.xlane.f32.xlu0 %v964_v43  ;;  %v967_v44 = vsel %vm963_vm1, %v956_v15, -inf }
 0x5f1   :  { %v965_v18 = vsel %vm963_vm1, %v954_v17, -inf }
 0x5f3   :  { %978 = vmax.xlane.f32.xlu1 %v967_v44  ;;  %v1219_v49 = vpop.f32.mrb[28].mxu0 }
 0x5f4   :  { %v959_v19 = vadd.f32 %v1219_v49, %v875_v3  ;;  %974 = vmax.xlane.f32.xlu0 %v965_v18  ;;  %v938_v20 = vpop.f32.mrb[29].mxu0 }
 0x5f5   :  { %v957_v22 = vadd.f32 %v938_v20, %v865_v62  ;;  %v1220_v23 = vpop.f32.mrb[30].mxu0 }
 0x5f6   :  { %v960_v25 = vadd.f32 %v1220_v23, %v879_v5  ;;  %v941_v26 = vpop.f32.mrb[31].mxu0  ;;  %v970_v29 = vsel %vm963_vm1, %v959_v19, -inf }
 0x5f7   :  { %v958_v24 = vadd.f32 %v941_v26, %v869_v1  ;;  %v968_v27 = vsel %vm963_vm1, %v957_v22, -inf }
 0x5f8   :  { %980 = vmax.xlane.f32.xlu0 %v968_v27  ;;  %v971_v30 = vsel %vm963_vm1, %v960_v25, -inf }
 0x5f9   :  { %v969_v28 = vsel %vm963_vm1, %v958_v24, -inf }
 0x5fa   :  { %982 = vmax.xlane.f32.xlu1 %v969_v28 }
 0x5fc   :  { %984 = vmax.xlane.f32.xlu0 %v970_v29 }
 0x5fe   :  { %986 = vmax.xlane.f32.xlu1 %v971_v30 }
 0x67c   :  { %v977_v31 = vpop.xlane.xlu1 %976 }
 0x67d   :  { %v1689_v33 = vsub.f32 %v966_v16, %v977_v31  ;;  %v973_v35 = vpop.xlane.xlu0 %972 }
 0x67e   :  { %v1691_v36 = vsub.f32 %v964_v43, %v973_v35 }
 0x67f   :  { %v1000_v37 = vmul.f32 1.442695, %v1689_v33 }
 0x680   :  { %v996_v32 = vmul.f32 1.442695, %v1691_v36  ;;  %v979_v34 = vpop.xlane.xlu1 %978 }
 0x681   :  { %1312 = vpow2.f32 %v1000_v37  ;;  %v1695_v38 = vsub.f32 %v967_v44, %v979_v34  ;;  %v975_v39 = vpop.xlane.xlu0 %974 }
 0x682   :  { %v1697_v40 = vsub.f32 %v965_v18, %v975_v39  ;;  %1314 = vpow2.f32 %v996_v32 }
 0x683   :  { %v1002_v41 = vmul.f32 1.442695, %v1695_v38 }
 0x684   :  { %v998_v42 = vmul.f32 1.442695, %v1697_v40 }
 0x685   :  { %1316 = vpow2.f32 %v1002_v41  ;;  %v981_v45 = vpop.xlane.xlu0 %980 }
 0x686   :  { %v1701_v46 = vsub.f32 %v968_v27, %v981_v45  ;;  %1318 = vpow2.f32 %v998_v42 }
 0x687   :  { %v983_v47 = vpop.xlane.xlu1 %982 }
 0x688   :  { %v1004_v48 = vmul.f32 1.442695, %v1701_v46  ;;  %v1704_v50 = vsub.f32 %v969_v28, %v983_v47 }
 0x689   :  { %v985_v51 = vpop.xlane.xlu0 %984 }
 0x68a   :  { %1320 = vpow2.f32 %v1004_v48  ;;  %v1006_v52 = vmul.f32 1.442695, %v1704_v50  ;;  %v1707_v53 = vsub.f32 %v970_v29, %v985_v51 }
 0x68b   :  { %v1313_v54 = vpop.eup %1312  ;;  %v987_v55 = vpop.xlane.xlu1 %986 }
 0x68c   :  { %1322 = vpow2.f32 %v1006_v52  ;;  %v1008_v56 = vmul.f32 1.442695, %v1707_v53  ;;  %v1710_v57 = vsub.f32 %v971_v30, %v987_v55  ;;  %1016 = vadd.xlane.f32.xlu0 %v1313_v54  ;;  %v1315_v58 = vpop.eup %1314 }
 0x68e   :  { %1324 = vpow2.f32 %v1008_v56  ;;  %v1010_v59 = vmul.f32 1.442695, %v1710_v57 }
 0x68f   :  { %v1317_v60 = vpop.eup %1316 }
 0x690   :  { %1326 = vpow2.f32 %v1010_v59  ;;  %1012 = vadd.xlane.f32.xlu0 %v1315_v58  ;;  %1018 = vadd.xlane.f32.xlu1 %v1317_v60  ;;  %v1319_v61 = vpop.eup %1318 }
 0x694   :  { %v1321_v62 = vpop.eup %1320  ;;  %1014 = vadd.xlane.f32.xlu1 %v1319_v61 }
 0x695   :  { %1020 = vadd.xlane.f32.xlu0 %v1321_v62 }
 0x696   :  { %v1323_v63 = vpop.eup %1322 }
 0x698   :  { %v1325_v1 = vpop.eup %1324  ;;  %1022 = vadd.xlane.f32.xlu1 %v1323_v63 }
 0x699   :  { %1024 = vadd.xlane.f32.xlu0 %v1325_v1 }
 0x69a   :  { %v1327_v2 = vpop.eup %1326 }
 0x69c   :  { %1026 = vadd.xlane.f32.xlu1 %v1327_v2 }
 0x719   :  { %v1017_v0 = vpop.xlane.xlu0 %1016 }
 0x71a   :  { %1328 = vlog2.f32 %v1017_v0 }
 0x71d   :  { %v1013_v3 = vpop.xlane.xlu0 %1012  ;;  %v1019_v4 = vpop.xlane.xlu1 %1018 }
 0x71e   :  { %1330 = vlog2.f32 %v1013_v3 }
 0x71f   :  { %1332 = vlog2.f32 %v1019_v4 }
 0x721   :  { %v1015_v5 = vpop.xlane.xlu1 %1014 }
 0x722   :  { %1334 = vlog2.f32 %v1015_v5  ;;  %v1021_v6 = vpop.xlane.xlu0 %1020 }
 0x723   :  { %1336 = vlog2.f32 %v1021_v6 }
 0x724   :  { %v1329_v7 = vpop.eup %1328 }
 0x725   :  { %v1033_v8 = vmul.f32 0.6931472, %v1329_v7  ;;  %v1023_v9 = vpop.xlane.xlu1 %1022 }
 0x726   :  { %1338 = vlog2.f32 %v1023_v9  ;;  %v1025_v10 = vpop.xlane.xlu0 %1024 }
 0x727   :  { %v1046_v11 = vsub.f32 %v1689_v33, %v1033_v8  ;;  %1340 = vlog2.f32 %v1025_v10 }
 0x728   :  { %v1331_v12 = vpop.eup %1330 }
 0x729   :  { %v1333_v13 = vpop.eup %1332  ;;  %1054 = vst [vmem:[#allocation11 + $0x10] sm:$0xff] %v1046_v11  ;;  %v1029_v14 = vmul.f32 0.6931472, %v1331_v12  ;;  %v1027_v15 = vpop.xlane.xlu1 %1026 }
 0x72a   :  { %v1035_v21 = vmul.f32 0.6931472, %v1333_v13  ;;  %1342 = vlog2.f32 %v1027_v15 }
 0x72b   :  { %v1044_v16 = vsub.f32 %v1691_v36, %v1029_v14 }
 0x72c   :  { %v1335_v17 = vpop.eup %1334  ;;  %v1047_v43 = vsub.f32 %v1695_v38, %v1035_v21 }
 0x72d   :  { %v1337_v44 = vpop.eup %1336  ;;  %1052 = vst [vmem:[#allocation11] sm:$0xff] %v1044_v16  ;;  %v1031_v49 = vmul.f32 0.6931472, %v1335_v17 }
 0x72e   :  { %1055 = vst [vmem:[#allocation11 + $0x18] sm:$0xff] %v1047_v43  ;;  %v1037_v18 = vmul.f32 0.6931472, %v1337_v44 }
 0x72f   :  { %v1045_v19 = vsub.f32 %v1697_v40, %v1031_v49 }
 0x730   :  { %v1339_v20 = vpop.eup %1338  ;;  %v1048_v22 = vsub.f32 %v1701_v46, %v1037_v18 }
 0x731   :  { %v1341_v23 = vpop.eup %1340  ;;  %1053 = vst [vmem:[#allocation11 + $0x8] sm:$0xff] %v1045_v19  ;;  %v1039_v25 = vmul.f32 0.6931472, %v1339_v20 }
 0x732   :  { %1056 = vst [vmem:[#allocation11 + $0x20] sm:$0xff] %v1048_v22  ;;  %v1041_v26 = vmul.f32 0.6931472, %v1341_v23 }
 0x733   :  { %v1049_v24 = vsub.f32 %v1704_v50, %v1039_v25 }
 0x734   :  { %v1343_v27 = vpop.eup %1342  ;;  %v1050_v28 = vsub.f32 %v1707_v53, %v1041_v26 }
 0x735   :  { %1057 = vst [vmem:[#allocation11 + $0x28] sm:$0xff] %v1049_v24  ;;  %v1043_v29 = vmul.f32 0.6931472, %v1343_v27 }
 0x736   :  { %1058 = vst [vmem:[#allocation11 + $0x30] sm:$0xff] %v1050_v28 }
 0x737   :  { %v1051_v30 = vsub.f32 %v1710_v57, %v1043_v29 }
 0x739   :  { %1059 = vst [vmem:[#allocation11 + $0x38] sm:$0xff] %v1051_v30 }
 0x73a   :  { %1465 = shalt.err (!%p1462_p2)
}
 0x73b   :  { %s1466_s24 = scalar_lea.hbm %s1743_s7, 1024 }
 0x73c   :  { %p1467_p3 = scmp.ne.s32.totalorder %s1743_s7, %s1466_s24  ;;  %p1470_p4 = scmp.lt.u32.totalorder %s1466_s24, %s1743_s7 }
 0x73e   :  { %p1472_p5 = pnand %p1470_p4, %p1467_p3 }
 0x740   :  { %1475 = shalt.err (!%p1472_p5)
}
 0x741   :  { %1071 = dma.vmem_to_hbm [thread:$0]  %s1066_s20, 1024, %s1743_s7, [#allocation4], %s1489_s25, %s1489_s25, %s1490_s27  }
 0x742   :  { %1482 = dma.done.wait [#allocation4], 1024  }
 0x743   :  { %1483 = vsyncadd [#allocation4], 4294966272 }
 0x744   :  { %1075 = vsyncpa [#allocation3], 1 }
 0x745   :  { %1076 = vsyncpa [#allocation6], 1 }
 0x746   :  { %1077 = vsyncpa [#allocation9], 1 }
 0x747   :  { %1078 = vsyncpa [#allocation4], 1 }

</bundles_post_ra>
